<compile_context>
chip_gen: v6e
topology: v6e:2x2x1
jax: 0.10.0
libtpu: 0.0.40
codegen_flags: <defaults>
</compile_context>

<pallas_src>
import jax
import jax.numpy as jnp
from jax.experimental import pallas as pl
from jax.experimental.pallas import tpu as pltpu


def nand_kernel(params_ref, x_ref, o_ref):
    # params_ref: SMEM f32[3] = [w0, w1, b]   (scalar reads, zero vreg cost)
    # x_ref:      VMEM (2, bn) feature-major tile
    # o_ref:      VMEM (1, bn) lane-dense output tile
    w0 = params_ref[0]
    w1 = params_ref[1]
    b = params_ref[2]
    x0 = x_ref[0:1, :]                                   # (1, bn)
    x1 = x_ref[1:2, :]                                   # (1, bn)
    logits = x0 * w0 + x1 * w1 + b                       # pure VPU FMAs
    o_ref[...] = jax.nn.sigmoid(logits).astype(o_ref.dtype)   # exp -> EUP


def nand_forward(x, w, b, *, block_n=8192):
    """x: (N, 2) f32, w: (2, 1) f32, b: (1, 1) f32  ->  (N, 1) f32."""
    n = x.shape[0]
    # Lane-dense block width: at least 128 lanes, at most `block_n`
    # (per-tile VMEM stays tiny on v5e/v6e/v7x even when double-buffered).
    bn = max(128, min(block_n, pl.next_power_of_2(n)))
    n_pad = pl.cdiv(n, bn) * bn

    # Feature-major, zero-padded to a multiple of the block width.
    xt = jnp.zeros((2, n_pad), jnp.float32).at[:, :n].set(
        x.T.astype(jnp.float32))
    # Flatten parameters into one tiny SMEM-resident vector [w0, w1, b].
    params = jnp.concatenate(
        [w.reshape(-1).astype(jnp.float32), b.reshape(-1).astype(jnp.float32)])

    grid = (n_pad // bn,)
    out = pl.pallas_call(
        nand_kernel,
        out_shape=jax.ShapeDtypeStruct((1, n_pad), jnp.float32),
        grid=grid,
        in_specs=[
            pl.BlockSpec(memory_space=pltpu.MemorySpace.SMEM),  # params (scalars)
            pl.BlockSpec((2, bn), lambda i: (0, i)),            # x tile (lane-dense)
        ],
        out_specs=pl.BlockSpec((1, bn), lambda i: (0, i)),
        compiler_params=pltpu.CompilerParams(
            dimension_semantics=("parallel",),
        ),
        cost_estimate=pl.CostEstimate(
            flops=5 * n_pad,
            transcendentals=n_pad,
            bytes_accessed=(2 * n_pad + n_pad) * 4 + 3 * 4,
        ),
    )(params, xt)

    # Back to the PyTorch module's (N, 1) convention; drop padding.
    return out[:, :n].T


def _sigmoid_ref(x, w, b):
    return 1.0 / (1.0 + jnp.exp(-(x @ w + b)))


if __name__ == "__main__":
    detail = 10

    # Module-faithful inputs: x from two concatenated linspaces, W/b zeros
    # (exactly NAND_Model.__init__ / the module-level x construction).
    x1 = jnp.linspace(0.0, 1.0, detail).reshape(-1, 1)
    x2 = jnp.linspace(0.0, 1.0, detail).reshape(-1, 1)
    x = jnp.concatenate([x1, x2], axis=1).astype(jnp.float32)   # (10, 2)
    W = jnp.zeros((2, 1), dtype=jnp.float32)
    b = jnp.zeros((1, 1), dtype=jnp.float32)

    out = jax.block_until_ready(nand_forward(x, W, b))
    assert out.shape == (detail, 1)
    assert jnp.allclose(out, _sigmoid_ref(x, W, b), atol=1e-6)

    # Stronger (still deterministic) check with non-trivial parameters.
    key = jax.random.PRNGKey(0)
    kw, kb = jax.random.split(key)
    W2 = jax.random.normal(kw, (2, 1), dtype=jnp.float32)
    b2 = jax.random.normal(kb, (1, 1), dtype=jnp.float32)
    out2 = jax.block_until_ready(nand_forward(x, W2, b2))
    assert jnp.allclose(out2, _sigmoid_ref(x, W2, b2), atol=1e-6)

    # TODO(synk): NAND_Model.loss (MSE) is plain JAX territory; only forward()
    # is implemented as a kernel.
    print("KERNEL_OK")
</pallas_src>

<mosaic_0001>
module attributes {stable_mosaic.version = 11 : i64} {
  func.func @nand_kernel(%arg0: i32, %arg1: memref<3xf32, #tpu.memory_space<smem>>, %arg2: memref<2x128xf32, #tpu.memory_space<vmem>>, %arg3: memref<1x128xf32, #tpu.memory_space<vmem>>) attributes {dimension_semantics = [#tpu.dimension_semantics<parallel>], iteration_bounds = array<i64: 1>, scalar_prefetch = 0 : i64, scratch_operands = 0 : i64, tpu.core_type = #tpu.core_type<tc>, window_params = [{transform_indices = @transform_0, window_bounds = array<i64: 3>}, {transform_indices = @transform_1, window_bounds = array<i64: 2, 128>}, {transform_indices = @transform_2, window_bounds = array<i64: 1, 128>}]} {
    %c0 = arith.constant 0 : index
    %0 = memref.load %arg1[%c0] : memref<3xf32, #tpu.memory_space<smem>>
    %c1 = arith.constant 1 : index
    %1 = memref.load %arg1[%c1] : memref<3xf32, #tpu.memory_space<smem>>
    %c2 = arith.constant 2 : index
    %2 = memref.load %arg1[%c2] : memref<3xf32, #tpu.memory_space<smem>>
    %c0_0 = arith.constant 0 : index
    %c0_1 = arith.constant 0 : index
    %3 = vector.load %arg2[%c0_0, %c0_1] : memref<2x128xf32, #tpu.memory_space<vmem>>, vector<1x128xf32>
    %c1_2 = arith.constant 1 : index
    %c0_3 = arith.constant 0 : index
    %4 = vector.load %arg2[%c1_2, %c0_3] : memref<2x128xf32, #tpu.memory_space<vmem>>, vector<1x128xf32>
    %5 = vector.broadcast %0 : f32 to vector<1x128xf32>
    %6 = arith.mulf %3, %5 : vector<1x128xf32>
    %7 = vector.broadcast %1 : f32 to vector<1x128xf32>
    %8 = arith.mulf %4, %7 : vector<1x128xf32>
    %9 = arith.addf %6, %8 : vector<1x128xf32>
    %10 = vector.broadcast %2 : f32 to vector<1x128xf32>
    %11 = arith.addf %9, %10 : vector<1x128xf32>
    %12 = arith.negf %11 : vector<1x128xf32>
    %13 = math.exp %12 : vector<1x128xf32>
    %cst = arith.constant 1.000000e+00 : f32
    %14 = vector.broadcast %cst : f32 to vector<1x128xf32>
    %15 = arith.addf %14, %13 : vector<1x128xf32>
    %16 = arith.divf %14, %15 : vector<1x128xf32>
    %c0_4 = arith.constant 0 : index
    %c0_5 = arith.constant 0 : index
    %17 = vector.load %arg3[%c0_4, %c0_5] : memref<1x128xf32, #tpu.memory_space<vmem>>, vector<1x128xf32>
    tpu.vector_store %arg3[%c0_4, %c0_5], %16 {strides = array<i32>} : memref<1x128xf32, #tpu.memory_space<vmem>>, vector<1x128xf32>,
    return
  }
  func.func @transform_0(%arg0: i32) -> i32 {
    %c0_i32 = arith.constant 0 : i32
    %c0_i32_0 = arith.constant 0 : i32
    return %c0_i32 : i32
  }
  func.func @transform_1(%arg0: i32) -> (i32, i32) {
    %c0_i32 = arith.constant 0 : i32
    %c0_i32_0 = arith.constant 0 : i32
    return %c0_i32, %arg0 : i32, i32
  }
  func.func @transform_2(%arg0: i32) -> (i32, i32) {
    %c0_i32 = arith.constant 0 : i32
    %c0_i32_0 = arith.constant 0 : i32
    return %c0_i32, %arg0 : i32, i32
  }
}

</mosaic_0001>

<bundles_post_ra>
// kernel: tpu_custom_call.1
= control target key start
LH: loop header
LB: loop body
LE: loop exit
PB: predicated region body
PF: predicated region fallthrough
CT: control target
= control target key end

     0   :  { %7 = vsyncpa [#allocation5], 0  ;;  %s161_s0 = inlined_call_operand.hbm [shape: f32[3], index: 0, kind: input, shape index: {}]   ;;  %s162_s1 = inlined_call_operand.hbm [shape: f32[2,128], index: 1, kind: input, shape index: {}]   ;;  %s163_s2 = inlined_call_operand.hbm [shape: f32[1,128], index: 2, kind: output, shape index: {}]  }
   0x1   :  { %8 = vsyncpa [#allocation3], 0 }
   0x2   :  { %9 = vsyncpa [#allocation4], 0  ;;  %s134_s9 = smov [#allocation2]   ;;  %s135_s12 = smov [#allocation6]  }
   0x3   :  { %17 = dma.hbm_to_smem %s161_s0, 16, %s134_s9, [#allocation5]  }
   0x4   :  { %s24_s13 = sshll.u32 %s135_s12, 4  ;;  %s25_s13 = int_to_ptr.vmem [resolvable:$true] %s24_s13 }
   0x5   :  { %s96_s14 = scalar_lea.vmem %s25_s13, 32  ;;  %p101_p1 = scmp.lt.s32.totalorder %s25_s13, %s25_s13 }
   0x6   :  { %p97_p0 = scmp.ne.s32.totalorder %s25_s13, %s96_s14  ;;  %p102_p2 = scmp.lt.s32.totalorder %s96_s14, %s96_s14 }
   0x8   :  { %p103_p3 = por %p102_p2, %p101_p1 }
   0xa   :  { %p104_p4 = pnand %p103_p3, %p97_p0 }
   0xc   :  { %107 = shalt.err (!%p104_p4)
}
   0xd   :  { %27 = dma.hbm_to_vmem [thread:$0]  %s162_s1, 32, %s25_s13, [#allocation3]  }
   0xe   :  { %128 = dma.done.wait [#allocation5], 16  }
   0xf   :  { %129 = vsyncadd [#allocation5], 4294967280 }
  0x10   :  { %130 = dma.done.wait [#allocation3], 32  }
  0x11   :  { %131 = vsyncadd [#allocation3], 4294967264 }
  0x12   :  { %34 = sfence }
  0x13   :  { %s35_s0 = sld [smem:[#allocation2]]  ;;  %v38_v0 = vld [vmem:[#allocation6] sm:$0x1]  ;;  %v39_v1 = vld [vmem:[#allocation6 + $0x1] sm:$0x1]  ;;  %s136_s1 = smov [#allocation7]  }
  0x14   :  { %s70_s17 = sld [smem:[#allocation2 + $0x1]]  ;;  %s60_s19 = sshll.u32 %s136_s1, 4  ;;  %s61_s19 = int_to_ptr.vmem [resolvable:$true] %s60_s19 }
  0x15   :  { %s71_s18 = sld [smem:[#allocation2 + $0x2]]  ;;  %s108_s20 = scalar_lea.vmem %s61_s19, 16 }
  0x16   :  { %p109_p5 = scmp.ne.s32.totalorder %s61_s19, %s108_s20  ;;  %s112_s21 = scalar_lea.vmem %s61_s19, 32 }
  0x17   :  { %p113_p6 = scmp.lt.s32.totalorder %s61_s19, %s61_s19  ;;  %p114_p7 = scmp.lt.s32.totalorder %s112_s21, %s108_s20 }
  0x19   :  { %v40_v2 = vstv %s35_s0  ;;  %p115_p8 = por %p114_p7, %p113_p6 }
  0x1a   :  { %v41_v3 = vmul.f32 %v40_v2, %v38_v0  ;;  %v42_v4 = vstv %s70_s17 }
  0x1b   :  { %v43_v5 = vmul.f32 %v42_v4, %v39_v1  ;;  %v45_v6 = vstv %s71_s18  ;;  %p116_p9 = pnand %p115_p8, %p109_p5 }
  0x1d   :  { %v44_v7 = vadd.f32 %v43_v5, %v41_v3 }
  0x1f   :  { %v46_v8 = vadd.f32 %v45_v6, %v44_v7 }
  0x21   :  { %v72_v9 = vmul.f32 -1.442695, %v46_v8 }
  0x23   :  { %76 = vpow2.f32 %v72_v9 }
  0x30   :  { %v77_v10 = vpop.eup %76 }
  0x31   :  { %v50_v11 = vadd.f32 1.0, %v77_v10 }
  0x33   :  { %78 = vrcp.f32 %v50_v11 }
  0x40   :  { %v79_v12 = vpop.eup %78 }
  0x41   :  { %53 = vst [vmem:[#allocation7] sm:$0x1] %v79_v12 }
  0x42   :  { %119 = shalt.err (!%p116_p9)
}
  0x43   :  { %63 = dma.vmem_to_hbm [thread:$0]  %s61_s19, 16, %s163_s2, [#allocation4]  }
  0x44   :  { %132 = dma.done.wait [#allocation4], 16  }
  0x45   :  { %133 = vsyncadd [#allocation4], 4294967280 }
  0x46   :  { %67 = vsyncpa [#allocation3], 1 }
  0x47   :  { %68 = vsyncpa [#allocation4], 1 }
  0x48   :  { %69 = vsyncpa [#allocation5], 1 }

</bundles_post_ra>
